<compile_context>
chip_gen: v7x
topology: tpu7x:2x2x1
jax: 0.10.0
libtpu: 0.0.40
codegen_flags: <defaults>
</compile_context>

<pallas_src>
import jax
import jax.numpy as jnp
from jax import lax
from jax.experimental import pallas as pl
from jax.experimental.pallas import tpu as pltpu

_SUBLANES = 8
_LANES = 128


class SimpleEmbeddingModelPallas:
    def __init__(self, property_keys, embedding_dims, hidden_dim=128,
                 dropout=0.0, seed=0):
        assert dropout == 0.0, "dropout>0 not implemented (eval semantics)"
        self.property_keys = list(property_keys)
        self.embedding_dims = dict(embedding_dims)
        self.hidden_dim = int(hidden_dim)

        key = jax.random.PRNGKey(seed)

        # Embedding tables: N(0, 1), like nn.Embedding.
        self.tables = {}
        for k in sorted(self.embedding_dims.keys()):
            key, sub = jax.random.split(key)
            num_emb, emb_dim = self.embedding_dims[k]
            self.tables[k] = jax.random.normal(sub, (num_emb, emb_dim),
                                               jnp.float32)

        input_dim = sum(d for _, d in self.embedding_dims.values())
        self.input_dim = input_dim

        def linear_init(key, fan_in, fan_out):
            k1, k2 = jax.random.split(key)
            lim = 1.0 / float(fan_in) ** 0.5
            w = jax.random.uniform(k1, (fan_in, fan_out), jnp.float32, -lim, lim)
            b = jax.random.uniform(k2, (1, fan_out), jnp.float32, -lim, lim)
            return w, b

        key, k1, k2, k3 = jax.random.split(key, 4)
        self.w1, self.b1 = linear_init(k1, input_dim, hidden_dim)
        self.w2, self.b2 = linear_init(k2, hidden_dim, hidden_dim)
        w3, b3 = linear_init(k3, hidden_dim, 1)
        self.w3_row = w3.T          # store head weight as a [1, hidden] row
        self.b3 = b3                # [1, 1]

        self._fwd_cache = {}        # key-order tuple -> jitted forward

    # ------------------------------------------------------------------ #
    # Fused kernel + jitted wrapper, built per property-key order so the
    # feature -> W1-row mapping matches the reference's `property.items()`
    # concatenation order.
    # ------------------------------------------------------------------ #
    def _build_forward(self, key_order):
        n_tables = len(key_order)
        dims = [self.embedding_dims[k][1] for k in key_order]
        offsets = []
        off = 0
        for d in dims:
            offsets.append(off)
            off += d
        assert off == self.input_dim

        hidden = self.hidden_dim
        tables = [self.tables[k] for k in key_order]
        w1, b1, w2, b2 = self.w1, self.b1, self.w2, self.b2
        w3_row, b3 = self.w3_row, self.b3

        def kernel(idx_ref, *refs):
            tbl_refs = refs[:n_tables]
            w1_ref, b1_ref, w2_ref, b2_ref, w3r_ref, b3_ref, o_ref = \
                refs[n_tables:]

            # ---- Layer 1 fused with the embedding gather + "concat" ----
            # acc = b1 + sum_k  emb_k(row idx_k) @ W1[offset_k : offset_k+d_k]
            acc = jnp.broadcast_to(b1_ref[...], (_SUBLANES, hidden))
            for t in range(n_tables):
                tbl = tbl_refs[t][...]                       # [num_emb, d_t]
                rid = lax.broadcasted_iota(jnp.int32, tbl.shape, 0)
                row = jnp.sum(jnp.where(rid == idx_ref[t], tbl, 0.0),
                              axis=0, keepdims=True)         # [1, d_t]
                row8 = jnp.broadcast_to(row, (_SUBLANES, dims[t]))
                w1_blk = w1_ref[offsets[t]:offsets[t] + dims[t], :]
                acc = acc + jnp.dot(row8, w1_blk,
                                    preferred_element_type=jnp.float32)
            h1 = jnp.maximum(acc, 0.0)                        # [8, hidden]
            # Dropout(p=0.0) == identity.

            # ---- Layer 2: Linear + ReLU (MXU) ----
            h2 = jnp.dot(h1, w2_ref[...],
                         preferred_element_type=jnp.float32) + b2_ref[...]
            h2 = jnp.maximum(h2, 0.0)                         # [8, hidden]

            # ---- Layer 3 (N=1 head) on VPU/XLU + Sigmoid ----
            z = jnp.sum(h2 * w3r_ref[...], axis=-1, keepdims=True) + b3_ref[...]
            s = jax.nn.sigmoid(z)                             # [8, 1]
            # Lane-dense output tile (unmasked vector stores).
            o_ref[...] = jnp.broadcast_to(s, (_SUBLANES, _LANES))

        smem_spec = pl.BlockSpec(memory_space=pltpu.MemorySpace.SMEM)
        vmem_spec = pl.BlockSpec(memory_space=pltpu.MemorySpace.VMEM)

        fused_call = pl.pallas_call(
            kernel,
            out_shape=jax.ShapeDtypeStruct((_SUBLANES, _LANES), jnp.float32),
            in_specs=[smem_spec] + [vmem_spec] * (n_tables + 6),
            out_specs=vmem_spec,
        )

        @jax.jit
        def forward(idx):
            out = fused_call(idx, *tables, w1, b1, w2, b2, w3_row, b3)
            return out[0:1, 0:1]                              # [1, 1]

        return forward

    # ------------------------------------------------------------------ #
    def __call__(self, prop):
        assert sorted(prop.keys()) == sorted(self.property_keys), (
            f"Invalid keys, Input: {set(prop.keys())} "
            f"Required {set(self.property_keys)}")
        key_order = tuple(prop.keys())   # matches reference `property.items()`
        if key_order not in self._fwd_cache:
            self._fwd_cache[key_order] = self._build_forward(key_order)
        idx = jnp.asarray([int(v) for _, v in prop.items()], dtype=jnp.int32)
        return self._fwd_cache[key_order](idx)

    # Pure-JAX reference of the same forward, for validation.
    def reference(self, prop):
        parts = [self.tables[k][jnp.asarray([v])] for k, v in prop.items()]
        x = jnp.concatenate(parts, axis=-1)                   # [1, input_dim]
        h1 = jnp.maximum(x @ self.w1 + self.b1, 0.0)
        h2 = jnp.maximum(h1 @ self.w2 + self.b2, 0.0)
        z = h2 @ self.w3_row.T + self.b3
        return jax.nn.sigmoid(z)


# --------------------------------- main --------------------------------- #
if __name__ == "__main__":
    property_keys = ["color", "size", "shape"]
    embedding_dims = {
        "color": (10, 8),
        "size": (5, 8),
        "shape": (7, 16),
    }  # input_dim = 32
    model = SimpleEmbeddingModelPallas(property_keys, embedding_dims,
                                       hidden_dim=32, dropout=0.0, seed=0)

    prop = {"color": 3, "size": 1, "shape": 6}
    out = model(prop)
    out = jax.block_until_ready(out)

    assert out.shape == (1, 1), out.shape
    assert bool(jnp.all((out >= 0.0) & (out <= 1.0)))

    ref = jax.block_until_ready(model.reference(prop))
    assert bool(jnp.allclose(out, ref, rtol=1e-5, atol=1e-5)), (out, ref)

    # Second call with a different property dict reuses the jitted forward.
    out2 = jax.block_until_ready(model({"color": 7, "size": 4, "shape": 0}))
    ref2 = jax.block_until_ready(model.reference({"color": 7, "size": 4,
                                                  "shape": 0}))
    assert bool(jnp.allclose(out2, ref2, rtol=1e-5, atol=1e-5)), (out2, ref2)

    print("KERNEL_OK")
</pallas_src>

<mosaic_0001>
module attributes {stable_mosaic.version = 11 : i64} {
  func.func @kernel(%arg0: memref<3xi32, #tpu.memory_space<smem>>, %arg1: memref<10x8xf32, #tpu.memory_space<vmem>>, %arg2: memref<5x8xf32, #tpu.memory_space<vmem>>, %arg3: memref<7x16xf32, #tpu.memory_space<vmem>>, %arg4: memref<32x32xf32, #tpu.memory_space<vmem>>, %arg5: memref<1x32xf32, #tpu.memory_space<vmem>>, %arg6: memref<32x32xf32, #tpu.memory_space<vmem>>, %arg7: memref<1x32xf32, #tpu.memory_space<vmem>>, %arg8: memref<1x32xf32, #tpu.memory_space<vmem>>, %arg9: memref<1x1xf32, #tpu.memory_space<vmem>>, %arg10: memref<8x128xf32, #tpu.memory_space<vmem>>) attributes {dimension_semantics = [], scalar_prefetch = 0 : i64, scratch_operands = 0 : i64, tpu.core_type = #tpu.core_type<tc>} {
    %c0 = arith.constant 0 : index
    %c0_0 = arith.constant 0 : index
    %0 = vector.load %arg5[%c0, %c0_0] : memref<1x32xf32, #tpu.memory_space<vmem>>, vector<1x32xf32>
    %1 = vector.shape_cast %0 : vector<1x32xf32> to vector<1x32xf32>
    %2 = vector.broadcast %1 : vector<1x32xf32> to vector<8x32xf32>
    %c0_1 = arith.constant 0 : index
    %c0_2 = arith.constant 0 : index
    %3 = vector.load %arg1[%c0_1, %c0_2] : memref<10x8xf32, #tpu.memory_space<vmem>>, vector<10x8xf32>
    %4 = tpu.iota {dimensions = array<i32: 0>} : vector<10x8xi32>
    %c0_3 = arith.constant 0 : index
    %5 = memref.load %arg0[%c0_3] : memref<3xi32, #tpu.memory_space<smem>>
    %6 = vector.broadcast %5 : i32 to vector<10x8xi32>
    %7 = arith.cmpi eq, %4, %6 : vector<10x8xi32>
    %cst = arith.constant 0.000000e+00 : f32
    %8 = vector.broadcast %cst : f32 to vector<10x8xf32>
    %9 = arith.select %7, %3, %8 : vector<10x8xi1>, vector<10x8xf32>
    %cst_4 = arith.constant dense<0.000000e+00> : vector<8xf32>
    %10 = vector.multi_reduction <add>, %9, %cst_4 [0] : vector<10x8xf32> to vector<8xf32>
    %11 = vector.shape_cast %10 : vector<8xf32> to vector<1x8xf32>
    %12 = vector.shape_cast %11 : vector<1x8xf32> to vector<1x8xf32>
    %13 = vector.broadcast %12 : vector<1x8xf32> to vector<8x8xf32>
    %c0_5 = arith.constant 0 : index
    %c0_6 = arith.constant 0 : index
    %14 = vector.load %arg4[%c0_5, %c0_6] : memref<32x32xf32, #tpu.memory_space<vmem>>, vector<8x32xf32>
    %cst_7 = arith.constant dense<0.000000e+00> : vector<8x32xf32>
    %15 = tpu.matmul %13, %14, %cst_7 {dimension_numbers = #tpu.dot_dimension_numbers<[1], [0], [0], [1], [0, 0, 1, 1], [], []>} : vector<8x8xf32>, vector<8x32xf32>, vector<8x32xf32> -> vector<8x32xf32>
    %16 = arith.addf %2, %15 : vector<8x32xf32>
    %c0_8 = arith.constant 0 : index
    %c0_9 = arith.constant 0 : index
    %17 = vector.load %arg2[%c0_8, %c0_9] : memref<5x8xf32, #tpu.memory_space<vmem>>, vector<5x8xf32>
    %18 = tpu.iota {dimensions = array<i32: 0>} : vector<5x8xi32>
    %c1 = arith.constant 1 : index
    %19 = memref.load %arg0[%c1] : memref<3xi32, #tpu.memory_space<smem>>
    %20 = vector.broadcast %19 : i32 to vector<5x8xi32>
    %21 = arith.cmpi eq, %18, %20 : vector<5x8xi32>
    %cst_10 = arith.constant 0.000000e+00 : f32
    %22 = vector.broadcast %cst_10 : f32 to vector<5x8xf32>
    %23 = arith.select %21, %17, %22 : vector<5x8xi1>, vector<5x8xf32>
    %cst_11 = arith.constant dense<0.000000e+00> : vector<8xf32>
    %24 = vector.multi_reduction <add>, %23, %cst_11 [0] : vector<5x8xf32> to vector<8xf32>
    %25 = vector.shape_cast %24 : vector<8xf32> to vector<1x8xf32>
    %26 = vector.shape_cast %25 : vector<1x8xf32> to vector<1x8xf32>
    %27 = vector.broadcast %26 : vector<1x8xf32> to vector<8x8xf32>
    %c8 = arith.constant 8 : index
    %c0_12 = arith.constant 0 : index
    %28 = vector.load %arg4[%c8, %c0_12] : memref<32x32xf32, #tpu.memory_space<vmem>>, vector<8x32xf32>
    %cst_13 = arith.constant dense<0.000000e+00> : vector<8x32xf32>
    %29 = tpu.matmul %27, %28, %cst_13 {dimension_numbers = #tpu.dot_dimension_numbers<[1], [0], [0], [1], [0, 0, 1, 1], [], []>} : vector<8x8xf32>, vector<8x32xf32>, vector<8x32xf32> -> vector<8x32xf32>
    %30 = arith.addf %16, %29 : vector<8x32xf32>
    %c0_14 = arith.constant 0 : index
    %c0_15 = arith.constant 0 : index
    %31 = vector.load %arg3[%c0_14, %c0_15] : memref<7x16xf32, #tpu.memory_space<vmem>>, vector<7x16xf32>
    %32 = tpu.iota {dimensions = array<i32: 0>} : vector<7x16xi32>
    %c2 = arith.constant 2 : index
    %33 = memref.load %arg0[%c2] : memref<3xi32, #tpu.memory_space<smem>>
    %34 = vector.broadcast %33 : i32 to vector<7x16xi32>
    %35 = arith.cmpi eq, %32, %34 : vector<7x16xi32>
    %cst_16 = arith.constant 0.000000e+00 : f32
    %36 = vector.broadcast %cst_16 : f32 to vector<7x16xf32>
    %37 = arith.select %35, %31, %36 : vector<7x16xi1>, vector<7x16xf32>
    %cst_17 = arith.constant dense<0.000000e+00> : vector<16xf32>
    %38 = vector.multi_reduction <add>, %37, %cst_17 [0] : vector<7x16xf32> to vector<16xf32>
    %39 = vector.shape_cast %38 : vector<16xf32> to vector<1x16xf32>
    %40 = vector.shape_cast %39 : vector<1x16xf32> to vector<1x16xf32>
    %41 = vector.broadcast %40 : vector<1x16xf32> to vector<8x16xf32>
    %c16 = arith.constant 16 : index
    %c0_18 = arith.constant 0 : index
    %42 = vector.load %arg4[%c16, %c0_18] : memref<32x32xf32, #tpu.memory_space<vmem>>, vector<16x32xf32>
    %cst_19 = arith.constant dense<0.000000e+00> : vector<8x32xf32>
    %43 = tpu.matmul %41, %42, %cst_19 {dimension_numbers = #tpu.dot_dimension_numbers<[1], [0], [0], [1], [0, 0, 1, 1], [], []>} : vector<8x16xf32>, vector<16x32xf32>, vector<8x32xf32> -> vector<8x32xf32>
    %44 = arith.addf %30, %43 : vector<8x32xf32>
    %cst_20 = arith.constant 0.000000e+00 : f32
    %45 = vector.broadcast %cst_20 : f32 to vector<8x32xf32>
    %46 = arith.maximumf %44, %45 : vector<8x32xf32>
    %c0_21 = arith.constant 0 : index
    %c0_22 = arith.constant 0 : index
    %47 = vector.load %arg6[%c0_21, %c0_22] : memref<32x32xf32, #tpu.memory_space<vmem>>, vector<32x32xf32>
    %cst_23 = arith.constant dense<0.000000e+00> : vector<8x32xf32>
    %48 = tpu.matmul %46, %47, %cst_23 {dimension_numbers = #tpu.dot_dimension_numbers<[1], [0], [0], [1], [0, 0, 1, 1], [], []>} : vector<8x32xf32>, vector<32x32xf32>, vector<8x32xf32> -> vector<8x32xf32>
    %c0_24 = arith.constant 0 : index
    %c0_25 = arith.constant 0 : index
    %49 = vector.load %arg7[%c0_24, %c0_25] : memref<1x32xf32, #tpu.memory_space<vmem>>, vector<1x32xf32>
    %50 = vector.broadcast %49 : vector<1x32xf32> to vector<8x32xf32>
    %51 = arith.addf %48, %50 : vector<8x32xf32>
    %cst_26 = arith.constant 0.000000e+00 : f32
    %52 = vector.broadcast %cst_26 : f32 to vector<8x32xf32>
    %53 = arith.maximumf %51, %52 : vector<8x32xf32>
    %c0_27 = arith.constant 0 : index
    %c0_28 = arith.constant 0 : index
    %54 = vector.load %arg8[%c0_27, %c0_28] : memref<1x32xf32, #tpu.memory_space<vmem>>, vector<1x32xf32>
    %55 = vector.broadcast %54 : vector<1x32xf32> to vector<8x32xf32>
    %56 = arith.mulf %53, %55 : vector<8x32xf32>
    %cst_29 = arith.constant dense<0.000000e+00> : vector<8xf32>
    %57 = vector.multi_reduction <add>, %56, %cst_29 [1] : vector<8x32xf32> to vector<8xf32>
    %58 = vector.shape_cast %57 : vector<8xf32> to vector<8x1xf32>
    %c0_30 = arith.constant 0 : index
    %c0_31 = arith.constant 0 : index
    %59 = vector.load %arg9[%c0_30, %c0_31] : memref<1x1xf32, #tpu.memory_space<vmem>>, vector<1x1xf32>
    %60 = vector.broadcast %59 : vector<1x1xf32> to vector<8x1xf32>
    %61 = arith.addf %58, %60 : vector<8x1xf32>
    %62 = arith.negf %61 : vector<8x1xf32>
    %63 = math.exp %62 : vector<8x1xf32>
    %cst_32 = arith.constant 1.000000e+00 : f32
    %64 = vector.broadcast %cst_32 : f32 to vector<8x1xf32>
    %65 = arith.addf %64, %63 : vector<8x1xf32>
    %66 = arith.divf %64, %65 : vector<8x1xf32>
    %67 = vector.shape_cast %66 : vector<8x1xf32> to vector<8x1xf32>
    %68 = vector.broadcast %67 : vector<8x1xf32> to vector<8x128xf32>
    %c0_33 = arith.constant 0 : index
    %c0_34 = arith.constant 0 : index
    %69 = vector.load %arg10[%c0_33, %c0_34] : memref<8x128xf32, #tpu.memory_space<vmem>>, vector<8x128xf32>
    tpu.vector_store %arg10[%c0_33, %c0_34], %68 {strides = array<i32>} : memref<8x128xf32, #tpu.memory_space<vmem>>, vector<8x128xf32>,
    return
  }
}

</mosaic_0001>

<bundles_post_ra>
// kernel: forward.1
= control target key start
LH: loop header
LB: loop body
LE: loop exit
PB: predicated region body
PF: predicated region fallthrough
CT: control target
= control target key end

     0   :  { %s862_s0 = inlined_call_operand.hbm [shape: s32[3], index: 0, kind: input, shape index: {}]   ;;  %s863_s1 = inlined_call_operand.hbm [shape: f32[10,8], index: 1, kind: input, shape index: {}]   ;;  %s864_s2 = inlined_call_operand.hbm [shape: f32[5,8], index: 2, kind: input, shape index: {}]   ;;  %s865_s3 = inlined_call_operand.vmem [shape: f32[7,16], index: 3, kind: input, shape index: {}]   ;;  %s866_s4 = inlined_call_operand.hbm [shape: f32[32,32], index: 4, kind: input, shape index: {}]   ;;  %s867_s5 = inlined_call_operand.vmem [shape: f32[1,32], index: 5, kind: input, shape index: {}]   ;;  %s868_s6 = inlined_call_operand.hbm [shape: f32[32,32], index: 6, kind: input, shape index: {}]   ;;  %s869_s7 = inlined_call_operand.vmem [shape: f32[1,32], index: 7, kind: input, shape index: {}]   ;;  %s870_s8 = inlined_call_operand.vmem [shape: f32[1,32], index: 8, kind: input, shape index: {}]   ;;  %s871_s9 = inlined_call_operand.<no memory space> [shape: f32[1,1], index: 9, kind: input, shape index: {}]   ;;  %s872_s10 = inlined_call_operand.vmem [shape: f32[8,128], index: 10, kind: output, shape index: {}]  }
   0x1   :  { %v15_v0 = vstv %s871_s9 }
   0x2   :  { %16 = vst [vmem:[#allocation2] sm:$0x1] %v15_v0 }
   0x3   :  { %17 = vsyncpa [#allocation5], 0 }
   0x4   :  { %18 = vsyncpa [#allocation4], 0 }
   0x5   :  { %19 = vsyncpa [#allocation8], 0 }
   0x6   :  { %20 = vsyncpa [#allocation11], 0  ;;  %s696_s15 = smov [#allocation7]   ;;  %s697_s17 = smov [#allocation6]  }
   0x7   :  { %s47_s16 = sshll.u32 %s696_s15, 4  ;;  %s34_s18 = sshll.u32 %s697_s17, 4  ;;  %s48_s16 = int_to_ptr.vmem [resolvable:$true] %s47_s16  ;;  %s35_s18 = int_to_ptr.vmem [resolvable:$true] %s34_s18 }
   0x8   :  { %s590_s21 = scalar_lea.hbm %s864_s2, 128 }
   0x9   :  { %p591_p0 = scmp.ne.s32.totalorder %s864_s2, %s590_s21  ;;  %p594_p1 = scmp.lt.u32.totalorder %s590_s21, %s864_s2 }
   0xb   :  { %p596_p2 = pnand %p594_p1, %p591_p0 }
   0xd   :  { %599 = shalt.err (!%p596_p2)
}
   0xe   :  { %s600_s25 = scalar_lea.vmem %s48_s16, 128  ;;  %p605_p4 = scmp.lt.s32.totalorder %s48_s16, %s48_s16 }
   0xf   :  { %p601_p3 = scmp.ne.s32.totalorder %s48_s16, %s600_s25  ;;  %p606_p5 = scmp.lt.s32.totalorder %s600_s25, %s600_s25 }
  0x11   :  { %p607_p6 = por %p606_p5, %p605_p4 }
  0x13   :  { %p608_p7 = pnand %p607_p6, %p601_p3 }
  0x15   :  { %611 = shalt.err (!%p608_p7)
}
  0x16   :  { %50 = dma.hbm_to_vmem [thread:$0]  %s864_s2, 128, %s48_s16, [#allocation8]  }
  0x17   :  { %s612_s30 = scalar_lea.hbm %s862_s0, 16 }
  0x18   :  { %p613_p8 = scmp.ne.s32.totalorder %s862_s0, %s612_s30  ;;  %p616_p9 = scmp.lt.u32.totalorder %s612_s30, %s862_s0 }
  0x1a   :  { %p618_p10 = pnand %p616_p9, %p613_p8 }
  0x1c   :  { %621 = shalt.err (!%p618_p10)
}
  0x1d   :  { %s698_s15 = smov [#allocation3]   ;;  %s622_s20 = scalar_lea.hbm %s863_s1, 256 }
  0x1e   :  { %28 = dma.hbm_to_smem %s862_s0, 16, %s698_s15, [#allocation5]  }
  0x1f   :  { %p623_p11 = scmp.ne.s32.totalorder %s863_s1, %s622_s20  ;;  %p626_p12 = scmp.lt.u32.totalorder %s622_s20, %s863_s1 }
  0x21   :  { %p628_p13 = pnand %p626_p12, %p623_p11 }
  0x23   :  { %631 = shalt.err (!%p628_p13)
}
  0x24   :  { %s632_s9 = scalar_lea.vmem %s35_s18, 256  ;;  %p637_p1 = scmp.lt.s32.totalorder %s35_s18, %s35_s18 }
  0x25   :  { %p633_p0 = scmp.ne.s32.totalorder %s35_s18, %s632_s9  ;;  %p638_p2 = scmp.lt.s32.totalorder %s632_s9, %s632_s9 }
  0x27   :  { %p639_p3 = por %p638_p2, %p637_p1 }
  0x29   :  { %p640_p4 = pnand %p639_p3, %p633_p0 }
  0x2b   :  { %643 = shalt.err (!%p640_p4)
}
  0x2c   :  { %s699_s0 = smov 128   ;;  %s700_s25 = smov 8  }
  0x2d   :  { %40 = dma.hbm_to_vmem [thread:$0]  %s863_s1, 256, %s35_s18, [#allocation4], %s699_s0, %s699_s0, %s700_s25  }
  0x2e   :  { %s701_s28 = smov [#allocation9]   ;;  %s702_s30 = smov [#allocation10]  }
  0x2f   :  { %s58_s29 = sshll.u32 %s701_s28, 4  ;;  %s72_s11 = sshll.u32 %s702_s30, 4  ;;  %s59_s29 = int_to_ptr.vmem [resolvable:$true] %s58_s29  ;;  %s73_s11 = int_to_ptr.vmem [resolvable:$true] %s72_s11 }
  0x30   :  { %s644_s14 = scalar_lea.hbm %s866_s4, 512 }
  0x31   :  { %p645_p5 = scmp.ne.s32.totalorder %s866_s4, %s644_s14  ;;  %p648_p6 = scmp.lt.u32.totalorder %s644_s14, %s866_s4 }
  0x33   :  { %p650_p7 = pnand %p648_p6, %p645_p5 }
  0x35   :  { %653 = shalt.err (!%p650_p7)
}
  0x36   :  { %s654_s1 = scalar_lea.vmem %s59_s29, 512  ;;  %p659_p9 = scmp.lt.s32.totalorder %s59_s29, %s59_s29 }
  0x37   :  { %p655_p8 = scmp.ne.s32.totalorder %s59_s29, %s654_s1  ;;  %p660_p10 = scmp.lt.s32.totalorder %s654_s1, %s654_s1 }
  0x39   :  { %p661_p11 = por %p660_p10, %p659_p9 }
  0x3b   :  { %p662_p12 = pnand %p661_p11, %p655_p8 }
  0x3d   :  { %665 = shalt.err (!%p662_p12)
}
  0x3e   :  { %64 = dma.hbm_to_vmem [thread:$0]  %s866_s4, 512, %s59_s29, [#allocation8], %s699_s0, %s699_s0, %s700_s25  }
  0x3f   :  { %s666_s22 = scalar_lea.hbm %s868_s6, 512 }
  0x40   :  { %p667_p13 = scmp.ne.s32.totalorder %s868_s6, %s666_s22  ;;  %p670_p0 = scmp.lt.u32.totalorder %s666_s22, %s868_s6 }
  0x42   :  { %p672_p1 = pnand %p670_p0, %p667_p13 }
  0x44   :  { %675 = shalt.err (!%p672_p1)
}
  0x45   :  { %s676_s27 = scalar_lea.vmem %s73_s11, 512  ;;  %p681_p3 = scmp.lt.s32.totalorder %s73_s11, %s73_s11 }
  0x46   :  { %p677_p2 = scmp.ne.s32.totalorder %s73_s11, %s676_s27  ;;  %p682_p4 = scmp.lt.s32.totalorder %s676_s27, %s676_s27 }
  0x48   :  { %p683_p5 = por %p682_p4, %p681_p3 }
  0x4a   :  { %p684_p6 = pnand %p683_p5, %p677_p2 }
  0x4c   :  { %687 = shalt.err (!%p684_p6)
}
  0x4d   :  { %78 = dma.hbm_to_vmem [thread:$0]  %s868_s6, 512, %s73_s11, [#allocation11], %s699_s0, %s699_s0, %s700_s25  }
  0x4e   :  { %688 = dma.done.wait [#allocation5], 16  }
  0x4f   :  { %689 = vsyncadd [#allocation5], 4294967280 }
  0x50   :  { %690 = dma.done.wait [#allocation4], 256  }
  0x51   :  { %691 = vsyncadd [#allocation4], 4294967040 }
  0x52   :  { %692 = dma.done.wait [#allocation8], 640  }
  0x53   :  { %693 = vsyncadd [#allocation8], 4294966656 }
  0x54   :  { %694 = dma.done.wait [#allocation11], 512  }
  0x55   :  { %695 = vsyncadd [#allocation11], 4294966784 }
  0x56   :  { %100 = sfence }
  0x57   :  { %v130_v1 = vld [vmem:[#allocation9] sm:$0xff]  ;;  %v110_v2 = vlaneseq  ;;  %v703_v3 = vmov 0.0   ;;  %vm704_vm0 = vmmov 0   ;;  %s113_s29 = sld [smem:[#allocation3]]  ;;  %s511_s6 = sld [smem:[#allocation3 + $0x1]]  ;;  %v705_v5 = vmov 0.0|0.0  }
  0x58   :  { %532 = vmatprep.subr.mxu0 %v703_v3  ;;  %534 = vmatprep.mubr.msk.f32.mxu0 %vm704_vm0, %v703_v3  ;;  %s513_s0 = sld [smem:[#allocation3 + $0x2]]  ;;  %v384_v7 = vld [vmem:[#allocation10] sm:$0xff]  ;;  %v385_v8 = vld [vmem:[#allocation10 + $0x8] sm:$0xff]  ;;  %v109_v11 = vld [vmem:[#allocation6 + $0x8] sm:$0x3]  ;;  %vm119_vm1 = vcmask 64512  }
  0x59   :  { %533 = vmatpush3.msra.mxu0 %v130_v1  ;;  %v111_v4 = vshrl.u32 %v110_v2, 7  ;;  %563 = vmatprep.subr.bf16.mxu1 %v705_v5  ;;  %v564_v9 = vpack.c.bf16 %v385_v8, %v384_v7  ;;  %v108_v10 = vld [vmem:[#allocation6] sm:$0xff]  ;;  %vm121_vm2 = vcmask 58368   ;;  %v205_v13 = vld [vmem:[#allocation7] sm:$0x1f]  ;;  %vm210_vm5 = vcmask 61440  }
  0x5a   :  { %537 = vmatprep.subr.mxu0 %v703_v3  ;;  %557 = vmatprep.mubr.msk.f32.mxu1 %vm704_vm0, %v703_v3  ;;  %v293_v15 = vld [vmem:[%s865_s3] sm:$0x7f]  ;;  %vm298_vm8 = vcmask 129024   ;;  %v218_v38 = vld [vmem:[#allocation9 + $0x8] sm:$0xff]  ;;  %vm308_vm9 = vcmask 130048   ;;  %vm395_vm10 = vcmask 261120  }
  0x5b   :  { %v112_v6 = vadd.s32 8, %v111_v4  ;;  %565 = vmatpush3.bf16.msra.mxu1 %v564_v9  ;;  %v306_v41 = vld [vmem:[#allocation9 + $0x10] sm:$0xff]  ;;  %v307_v42 = vld [vmem:[#allocation9 + $0x18] sm:$0xff]  ;;  %v706_v0 = vmov 0   ;;  %v518_v1 = vld [vmem:[#allocation2] ss:$0 sm:$0xff] }
  0x5c   :  { %566 = vmatprep.subr.bf16.mxu1 %v705_v5  ;;  %v561_v45 = vpack.c.bf16 %v307_v42, %v306_v41  ;;  %v386_v48 = vld [vmem:[#allocation10 + $0x10] sm:$0xff]  ;;  %v387_v49 = vld [vmem:[#allocation10 + $0x18] sm:$0xff]  ;;  %585 = vset.pattern.permute.xlu0 %v706_v0 }
  0x5d   :  { %v114_v12 = vstv %s113_s29  ;;  %v207_v14 = vstv %s511_s6  ;;  %v567_v50 = vpack.c.bf16 %v387_v49, %v386_v48  ;;  %v509_v51 = vld [vmem:[%s867_s5] ss:$0 sm:$0xff] }
  0x5e   :  { %vm115_vm3 = vcmp.eq.s32.totalorder %v111_v4, %v114_v12  ;;  %vm116_vm4 = vcmp.eq.s32.totalorder %v112_v6, %v114_v12  ;;  %vm208_vm6 = vcmp.eq.s32.totalorder %v111_v4, %v207_v14  ;;  %v295_v18 = vstv %s513_s0  ;;  %v515_v56 = vld [vmem:[%s869_s7] ss:$0 sm:$0xff] }
  0x5f   :  { %v117_v16 = vsel %vm115_vm3, %v108_v10, 0.0  ;;  %v118_v17 = vsel %vm116_vm4, %v109_v11, 0.0  ;;  %v209_v21 = vsel %vm208_vm6, %v205_v13, 0.0  ;;  %vm296_vm7 = vcmp.eq.s32.totalorder %v111_v4, %v295_v18  ;;  %568 = vmatpush3.bf16.msra.mxu1 %v567_v50  ;;  %v517_v60 = vld [vmem:[%s870_s8] ss:$0 sm:$0xff] }
  0x60   :  { %v120_v19 = vsel %vm119_vm1, %v117_v16, 0.0  ;;  %v122_v20 = vsel %vm121_vm2, %v118_v17, 0.0  ;;  %v211_v23 = vsel %vm210_vm5, %v209_v21, 0.0  ;;  %v297_v24 = vsel %vm296_vm7, %v293_v15, 0.0 }
  0x61   :  { %v123_v22 = vadd.f32 %v122_v20, %v120_v19  ;;  %v212_v25 = vrot.slane %v211_v23, 4  ;;  %v299_v28 = vsel %vm298_vm8, %v297_v24, 0.0 }
  0x62   :  { %v300_v32 = vrot.slane %v299_v28, 4 }
  0x63   :  { %v124_v26 = vrot.slane %v123_v22, 4  ;;  %v213_v27 = vadd.f32 %v212_v25, %v211_v23 }
  0x64   :  { %v301_v36 = vadd.f32 %v300_v32, %v299_v28 }
  0x65   :  { %v125_v29 = vadd.f32 %v124_v26, %v123_v22  ;;  %v214_v31 = vrot.slane %v213_v27, 2 }
  0x66   :  { %v302_v40 = vrot.slane %v301_v36, 2 }
  0x67   :  { %v126_v30 = vrot.slane %v125_v29, 2  ;;  %v215_v35 = vadd.f32 %v214_v31, %v213_v27 }
  0x68   :  { %v303_v44 = vadd.f32 %v302_v40, %v301_v36 }
  0x69   :  { %v127_v33 = vadd.f32 %v126_v30, %v125_v29  ;;  %v216_v39 = vrot.slane %v215_v35, 1 }
  0x6a   :  { %v304_v46 = vrot.slane %v303_v44, 1 }
  0x6b   :  { %v128_v34 = vrot.slane %v127_v33, 1  ;;  %v217_v43 = vadd.f32 %v216_v39, %v215_v35 }
  0x6c   :  { %v305_v47 = vadd.f32 %v304_v46, %v303_v44 }
  0x6d   :  { %v129_v37 = vadd.f32 %v128_v34, %v127_v33 }
  0x6f   :  { %535 = vmatmul.mubr.msk.f32.vlgmr.msra.gmra.mrb[0].mxu0 %vm119_vm1, %v129_v37 }
  0x70   :  { %538 = vmatpush3.msra.mxu0 %v218_v38  ;;  %539 = vmatprep.mubr.msk.f32.mxu0 %vm704_vm0, %v703_v3 }
  0x71   :  { %560 = vmatprep.subr.bf16.mxu0 %v705_v5 }
  0x77   :  { %540 = vmatmul.mubr.msk.f32.vlgmr.msra.gmra.mrb[0].mxu0 %vm119_vm1, %v217_v43 }
  0x78   :  { %562 = vmatpush3.bf16.msra.mxu0 %v561_v45  ;;  %546 = vmatprep.mubr.msk.f32.mxu0 %vm704_vm0, %v703_v3 }
  0x7f   :  { %547 = vmatmul.mubr.msk.f32.vlgmr.msra.gmra.mrb[0].mxu0 %vm308_vm9, %v305_v47 }
 0x152   :  { %v378_v52 = vpop.f32.mrb[0].mxu0 }
 0x153   :  { %v569_v53 = vadd.f32 %v509_v51, %v378_v52  ;;  %v548_v54 = vpop.f32.mrb[1].mxu0 }
 0x155   :  { %v383_v55 = vmax.f32 %v569_v53, 0.0 }
 0x157   :  { %558 = vmatmul.mubr.msk.f32.vlgmr.msra.gmra.mrb[0].mxu1 %vm395_vm10, %v383_v55 }
 0x22a   :  { %v465_v57 = vpop.f32.mrb[0].mxu1 }
 0x22b   :  { %v466_v58 = vadd.f32 %v515_v56, %v465_v57  ;;  %v559_v59 = vpop.f32.mrb[1].mxu1 }
 0x22d   :  { %v469_v61 = vmax.f32 %v466_v58, 0.0 }
 0x22f   :  { %v477_v62 = vmul.f32 %v517_v60, %v469_v61 }
 0x231   :  { %v478_v63 = vsel %vm395_vm10, %v477_v62, 0.0 }
 0x232   :  { %479 = vadd.xlane.f32.xlu0 %v478_v63 }
 0x2bf   :  { %v480_v2 = vpop.xlane.xlu0 %479 }
 0x2c0   :  { %v488_v3 = vadd.f32 %v518_v1, %v480_v2 }
 0x2c2   :  { %v519_v4 = vmul.f32 -1.442695, %v488_v3 }
 0x2c4   :  { %586 = vpow2.f32 %v519_v4 }
 0x2ce   :  { %v587_v5 = vpop.eup %586 }
 0x2cf   :  { %v492_v6 = vadd.f32 1.0, %v587_v5 }
 0x2d1   :  { %588 = vrcp.f32 %v492_v6 }
 0x2db   :  { %v589_v7 = vpop.eup %588 }
 0x2dc   :  { %497 = vperm.xlu0 %585, %v589_v7  }
 0x35b   :  { %v498_v8 = vpop.permute.xlu0 %497 }
 0x35c   :  { %500 = vst [vmem:[%s872_s10] sm:$0xff] %v498_v8 }
 0x35d   :  { %505 = vsyncpa [#allocation4], 1 }
 0x35e   :  { %506 = vsyncpa [#allocation8], 1 }
 0x35f   :  { %507 = vsyncpa [#allocation11], 1 }
 0x360   :  { %508 = vsyncpa [#allocation5], 1 }

</bundles_post_ra>
